<compile_context>
chip_gen: v5e
topology: v5e:2x2
jax: 0.10.0
libtpu: 0.0.40
codegen_flags: <defaults>
</compile_context>

<pallas_src>
import functools
import math

import jax
import jax.numpy as jnp
from jax import lax
from jax.experimental import pallas as pl
from jax.experimental.pallas import tpu as pltpu

_EPS = 1e-5
_LANES = 128


# ----------------------------- kernels --------------------------------------

def _residual_ln_packed_kernel(x_ref, y_ref, g_ref, b_ref, s_ref, st_ref, o_ref, *, inv_feat):
    """Lane-dense path: each 128-lane physical row packs G = 128 // H logical rows.

    Per-group (per logical row) mean / variance are computed with segment-sum
    matmuls (MXU, free slot) and broadcast back to lanes with the transposed
    segment matrix, so all loads/stores stay 128-lane dense (unmasked vst).
    """
    x = x_ref[...]            # (TR, 128)
    y = y_ref[...]            # (TR, 128)
    seg = s_ref[...]          # (128, G)  one-hot: lane -> group
    seg_t = st_ref[...]       # (G, 128)  broadcast-back

    mu = jnp.dot(y, seg, preferred_element_type=jnp.float32) * inv_feat       # (TR, G)
    mu_b = jnp.dot(mu, seg_t, preferred_element_type=jnp.float32)             # (TR, 128)
    c = y - mu_b
    var = jnp.dot(c * c, seg, preferred_element_type=jnp.float32) * inv_feat  # (TR, G)
    var_b = jnp.dot(var, seg_t, preferred_element_type=jnp.float32)           # (TR, 128)
    norm = c * lax.rsqrt(var_b + _EPS)
    o_ref[...] = (x + norm * g_ref[...] + b_ref[...]).astype(o_ref.dtype)


def _residual_ln_kernel(x_ref, y_ref, g_ref, b_ref, o_ref):
    """Generic fallback: LayerNorm over the last (lane) axis, then residual add."""
    x = x_ref[...]
    y = y_ref[...]
    mu = jnp.mean(y, axis=-1, keepdims=True)
    c = y - mu
    var = jnp.mean(c * c, axis=-1, keepdims=True)
    o_ref[...] = (x + c * lax.rsqrt(var + _EPS) * g_ref[...] + b_ref[...]).astype(o_ref.dtype)


# ----------------------------- wrapper ---------------------------------------

def _pick_row_tile(n_rows):
    # Prefer big tiles (mem-bound: 512-1024 rows ~ roofline); fall back to smaller
    # divisors; full extent is always legal.
    for t in (1024, 512, 256, 128, 64, 32, 16, 8):
        if n_rows % t == 0:
            return t
    return n_rows


_COMPILER_PARAMS = pltpu.CompilerParams(
    dimension_semantics=("parallel",),          # row tiles independent -> megacore on v7x
    vmem_limit_bytes=64 * 1024 * 1024,
)


def residual_connection(x, att_features, gamma, beta, *, row_tile=None):
    """Computes x + LayerNorm(att_features) (dropout = identity, eval semantics)."""
    # TODO(synk): nn.Dropout is identity here (inference); no RNG dropout mask is applied.
    orig_shape = x.shape
    out_dtype = x.dtype
    h = orig_shape[-1]
    n = math.prod(orig_shape[:-1]) if len(orig_shape) > 1 else 1

    x2 = x.reshape(n, h).astype(jnp.float32)
    y2 = att_features.reshape(n, h).astype(jnp.float32)
    gamma = gamma.astype(jnp.float32)
    beta = beta.astype(jnp.float32)

    g = _LANES // h if (h <= _LANES and _LANES % h == 0) else 0
    use_packed = (g > 1) and (n % g == 0)

    if use_packed:
        np_rows = n // g
        xw = x2.reshape(np_rows, _LANES)                    # free contiguous reshape
        yw = y2.reshape(np_rows, _LANES)
        gamma_t = jnp.tile(gamma, g).reshape(1, _LANES)     # gamma[l % h] per lane
        beta_t = jnp.tile(beta, g).reshape(1, _LANES)
        lane_grp = jnp.arange(_LANES, dtype=jnp.int32) // h
        grp = jnp.arange(g, dtype=jnp.int32)
        seg = (lane_grp[:, None] == grp[None, :]).astype(jnp.float32)   # (128, G)
        seg_t = jnp.transpose(seg)                                       # (G, 128)

        tr = row_tile or _pick_row_tile(np_rows)
        grid = (np_rows // tr,)
        kernel = functools.partial(_residual_ln_packed_kernel, inv_feat=1.0 / h)
        out = pl.pallas_call(
            kernel,
            out_shape=jax.ShapeDtypeStruct((np_rows, _LANES), out_dtype),
            grid=grid,
            in_specs=[
                pl.BlockSpec((tr, _LANES), lambda i: (i, 0)),
                pl.BlockSpec((tr, _LANES), lambda i: (i, 0)),
                pl.BlockSpec((1, _LANES), lambda i: (0, 0)),
                pl.BlockSpec((1, _LANES), lambda i: (0, 0)),
                pl.BlockSpec((_LANES, g), lambda i: (0, 0)),
                pl.BlockSpec((g, _LANES), lambda i: (0, 0)),
            ],
            out_specs=pl.BlockSpec((tr, _LANES), lambda i: (i, 0)),
            compiler_params=_COMPILER_PARAMS,
        )(xw, yw, gamma_t, beta_t, seg, seg_t)
        return out.reshape(orig_shape)

    # Generic fallback (H not a divisor of 128, or row count not packable).
    tr = row_tile or _pick_row_tile(n)
    grid = (n // tr,)
    out = pl.pallas_call(
        _residual_ln_kernel,
        out_shape=jax.ShapeDtypeStruct((n, h), out_dtype),
        grid=grid,
        in_specs=[
            pl.BlockSpec((tr, h), lambda i: (i, 0)),
            pl.BlockSpec((tr, h), lambda i: (i, 0)),
            pl.BlockSpec((1, h), lambda i: (0, 0)),
            pl.BlockSpec((1, h), lambda i: (0, 0)),
        ],
        out_specs=pl.BlockSpec((tr, h), lambda i: (i, 0)),
        compiler_params=_COMPILER_PARAMS,
    )(x2, y2, gamma.reshape(1, h), beta.reshape(1, h))
    return out.reshape(orig_shape)


# ----------------------------- reference & main -------------------------------

def _reference(x, y, gamma, beta):
    yf = y.astype(jnp.float32)
    mu = jnp.mean(yf, axis=-1, keepdims=True)
    var = jnp.mean((yf - mu) ** 2, axis=-1, keepdims=True)
    return x + (yf - mu) * lax.rsqrt(var + _EPS) * gamma + beta


if __name__ == "__main__":
    key = jax.random.PRNGKey(0)

    # Small shapes consistent with the module: seq=8, batch=2, hidden(_size)=32.
    T, B, H = 8, 2, 32
    k1, k2, k3, k4 = jax.random.split(key, 4)
    x = jax.random.normal(k1, (T, B, H), jnp.float32)
    att = jax.random.normal(k2, (T, B, H), jnp.float32)
    gamma = jnp.ones((H,), jnp.float32)   # nn.LayerNorm default init
    beta = jnp.zeros((H,), jnp.float32)

    out = residual_connection(x, att, gamma, beta)
    out = jax.block_until_ready(out)
    assert out.shape == (T, B, H) and out.dtype == jnp.float32
    ref = _reference(x, att, gamma, beta)
    assert jnp.allclose(out, ref, atol=1e-4, rtol=1e-4), float(jnp.max(jnp.abs(out - ref)))

    # Larger packed-path check (exercises row tiling, grid > 1, non-trivial affine).
    T2, B2, H2 = 512, 8, 32
    xa = jax.random.normal(k3, (T2, B2, H2), jnp.float32)
    ya = jax.random.normal(k4, (T2, B2, H2), jnp.float32)
    ga = 1.0 + 0.1 * jnp.arange(H2, dtype=jnp.float32)
    ba = 0.01 * jnp.arange(H2, dtype=jnp.float32)
    out2 = jax.block_until_ready(residual_connection(xa, ya, ga, ba))
    assert jnp.allclose(out2, _reference(xa, ya, ga, ba), atol=1e-4, rtol=1e-4)

    # Generic-fallback check (H does not divide 128 -> lane-masked path, grid > 1).
    H3 = 48
    xb = jax.random.normal(k3, (T, B, H3), jnp.float32)
    yb = jax.random.normal(k4, (T, B, H3), jnp.float32)
    gb = jnp.ones((H3,), jnp.float32)
    bb = jnp.zeros((H3,), jnp.float32)
    out3 = jax.block_until_ready(residual_connection(xb, yb, gb, bb))
    assert jnp.allclose(out3, _reference(xb, yb, gb, bb), atol=1e-4, rtol=1e-4)

    print("KERNEL_OK")
</pallas_src>

<mosaic_0001>
module attributes {stable_mosaic.version = 11 : i64} {
  func.func @_residual_ln_packed_kernel(%arg0: i32, %arg1: memref<4x128xf32, #tpu.memory_space<vmem>>, %arg2: memref<4x128xf32, #tpu.memory_space<vmem>>, %arg3: memref<1x128xf32, #tpu.memory_space<vmem>>, %arg4: memref<1x128xf32, #tpu.memory_space<vmem>>, %arg5: memref<128x4xf32, #tpu.memory_space<vmem>>, %arg6: memref<4x128xf32, #tpu.memory_space<vmem>>, %arg7: memref<4x128xf32, #tpu.memory_space<vmem>>) attributes {dimension_semantics = [#tpu.dimension_semantics<parallel>], iteration_bounds = array<i64: 1>, scalar_prefetch = 0 : i64, scratch_operands = 0 : i64, tpu.core_type = #tpu.core_type<tc>, window_params = [{transform_indices = @transform_0, window_bounds = array<i64: 4, 128>}, {transform_indices = @transform_1, window_bounds = array<i64: 4, 128>}, {pipeline_mode = #tpu.pipeline_mode<synchronous>, transform_indices = @transform_2, window_bounds = array<i64: 1, 128>}, {pipeline_mode = #tpu.pipeline_mode<synchronous>, transform_indices = @transform_3, window_bounds = array<i64: 1, 128>}, {pipeline_mode = #tpu.pipeline_mode<synchronous>, transform_indices = @transform_4, window_bounds = array<i64: 128, 4>}, {pipeline_mode = #tpu.pipeline_mode<synchronous>, transform_indices = @transform_5, window_bounds = array<i64: 4, 128>}, {transform_indices = @transform_6, window_bounds = array<i64: 4, 128>}]} {
    %c0 = arith.constant 0 : index
    %c0_0 = arith.constant 0 : index
    %0 = vector.load %arg1[%c0, %c0_0] : memref<4x128xf32, #tpu.memory_space<vmem>>, vector<4x128xf32>
    %c0_1 = arith.constant 0 : index
    %c0_2 = arith.constant 0 : index
    %1 = vector.load %arg2[%c0_1, %c0_2] : memref<4x128xf32, #tpu.memory_space<vmem>>, vector<4x128xf32>
    %c0_3 = arith.constant 0 : index
    %c0_4 = arith.constant 0 : index
    %2 = vector.load %arg5[%c0_3, %c0_4] : memref<128x4xf32, #tpu.memory_space<vmem>>, vector<128x4xf32>
    %c0_5 = arith.constant 0 : index
    %c0_6 = arith.constant 0 : index
    %3 = vector.load %arg6[%c0_5, %c0_6] : memref<4x128xf32, #tpu.memory_space<vmem>>, vector<4x128xf32>
    %cst = arith.constant dense<0.000000e+00> : vector<4x4xf32>
    %4 = tpu.matmul %1, %2, %cst {dimension_numbers = #tpu.dot_dimension_numbers<[1], [0], [0], [1], [0, 0, 1, 1], [], []>} : vector<4x128xf32>, vector<128x4xf32>, vector<4x4xf32> -> vector<4x4xf32>
    %cst_7 = arith.constant 3.125000e-02 : f32
    %5 = vector.broadcast %cst_7 : f32 to vector<4x4xf32>
    %6 = arith.mulf %4, %5 : vector<4x4xf32>
    %cst_8 = arith.constant dense<0.000000e+00> : vector<4x128xf32>
    %7 = tpu.matmul %6, %3, %cst_8 {dimension_numbers = #tpu.dot_dimension_numbers<[1], [0], [0], [1], [0, 0, 1, 1], [], []>} : vector<4x4xf32>, vector<4x128xf32>, vector<4x128xf32> -> vector<4x128xf32>
    %8 = arith.subf %1, %7 : vector<4x128xf32>
    %9 = arith.mulf %8, %8 : vector<4x128xf32>
    %cst_9 = arith.constant dense<0.000000e+00> : vector<4x4xf32>
    %10 = tpu.matmul %9, %2, %cst_9 {dimension_numbers = #tpu.dot_dimension_numbers<[1], [0], [0], [1], [0, 0, 1, 1], [], []>} : vector<4x128xf32>, vector<128x4xf32>, vector<4x4xf32> -> vector<4x4xf32>
    %cst_10 = arith.constant 3.125000e-02 : f32
    %11 = vector.broadcast %cst_10 : f32 to vector<4x4xf32>
    %12 = arith.mulf %10, %11 : vector<4x4xf32>
    %cst_11 = arith.constant dense<0.000000e+00> : vector<4x128xf32>
    %13 = tpu.matmul %12, %3, %cst_11 {dimension_numbers = #tpu.dot_dimension_numbers<[1], [0], [0], [1], [0, 0, 1, 1], [], []>} : vector<4x4xf32>, vector<4x128xf32>, vector<4x128xf32> -> vector<4x128xf32>
    %cst_12 = arith.constant 9.99999974E-6 : f32
    %14 = vector.broadcast %cst_12 : f32 to vector<4x128xf32>
    %15 = arith.addf %13, %14 : vector<4x128xf32>
    %16 = math.rsqrt %15 : vector<4x128xf32>
    %17 = arith.mulf %8, %16 : vector<4x128xf32>
    %c0_13 = arith.constant 0 : index
    %c0_14 = arith.constant 0 : index
    %18 = vector.load %arg3[%c0_13, %c0_14] : memref<1x128xf32, #tpu.memory_space<vmem>>, vector<1x128xf32>
    %19 = vector.broadcast %18 : vector<1x128xf32> to vector<4x128xf32>
    %20 = arith.mulf %17, %19 : vector<4x128xf32>
    %21 = arith.addf %0, %20 : vector<4x128xf32>
    %c0_15 = arith.constant 0 : index
    %c0_16 = arith.constant 0 : index
    %22 = vector.load %arg4[%c0_15, %c0_16] : memref<1x128xf32, #tpu.memory_space<vmem>>, vector<1x128xf32>
    %23 = vector.broadcast %22 : vector<1x128xf32> to vector<4x128xf32>
    %24 = arith.addf %21, %23 : vector<4x128xf32>
    %c0_17 = arith.constant 0 : index
    %c0_18 = arith.constant 0 : index
    %25 = vector.load %arg7[%c0_17, %c0_18] : memref<4x128xf32, #tpu.memory_space<vmem>>, vector<4x128xf32>
    tpu.vector_store %arg7[%c0_17, %c0_18], %24 {strides = array<i32>} : memref<4x128xf32, #tpu.memory_space<vmem>>, vector<4x128xf32>,
    return
  }
  func.func @transform_0(%arg0: i32) -> (i32, i32) {
    %c0_i32 = arith.constant 0 : i32
    %c0_i32_0 = arith.constant 0 : i32
    return %arg0, %c0_i32 : i32, i32
  }
  func.func @transform_1(%arg0: i32) -> (i32, i32) {
    %c0_i32 = arith.constant 0 : i32
    %c0_i32_0 = arith.constant 0 : i32
    return %arg0, %c0_i32 : i32, i32
  }
  func.func @transform_2(%arg0: i32) -> (i32, i32) {
    %c0_i32 = arith.constant 0 : i32
    %c0_i32_0 = arith.constant 0 : i32
    %c0_i32_1 = arith.constant 0 : i32
    return %c0_i32, %c0_i32_0 : i32, i32
  }
  func.func @transform_3(%arg0: i32) -> (i32, i32) {
    %c0_i32 = arith.constant 0 : i32
    %c0_i32_0 = arith.constant 0 : i32
    %c0_i32_1 = arith.constant 0 : i32
    return %c0_i32, %c0_i32_0 : i32, i32
  }
  func.func @transform_4(%arg0: i32) -> (i32, i32) {
    %c0_i32 = arith.constant 0 : i32
    %c0_i32_0 = arith.constant 0 : i32
    %c0_i32_1 = arith.constant 0 : i32
    return %c0_i32, %c0_i32_0 : i32, i32
  }
  func.func @transform_5(%arg0: i32) -> (i32, i32) {
    %c0_i32 = arith.constant 0 : i32
    %c0_i32_0 = arith.constant 0 : i32
    %c0_i32_1 = arith.constant 0 : i32
    return %c0_i32, %c0_i32_0 : i32, i32
  }
  func.func @transform_6(%arg0: i32) -> (i32, i32) {
    %c0_i32 = arith.constant 0 : i32
    %c0_i32_0 = arith.constant 0 : i32
    return %arg0, %c0_i32 : i32, i32
  }
}

</mosaic_0001>

<bundles_post_ra>
// kernel: tpu_custom_call.1
= control target key start
LH: loop header
LB: loop body
LE: loop exit
PB: predicated region body
PF: predicated region fallthrough
CT: control target
= control target key end

     0   :  { %s314_s0 = inlined_call_operand.vmem [shape: f32[4,128], index: 0, kind: input, shape index: {}]   ;;  %s315_s1 = inlined_call_operand.vmem [shape: f32[4,128], index: 1, kind: input, shape index: {}]   ;;  %s316_s2 = inlined_call_operand.vmem [shape: f32[1,128], index: 2, kind: input, shape index: {}]   ;;  %s317_s3 = inlined_call_operand.vmem [shape: f32[1,128], index: 3, kind: input, shape index: {}]   ;;  %s318_s4 = inlined_call_operand.vmem [shape: f32[128,4], index: 4, kind: input, shape index: {}]   ;;  %s319_s5 = inlined_call_operand.vmem [shape: f32[4,128], index: 5, kind: input, shape index: {}]   ;;  %s320_s6 = inlined_call_operand.hbm [shape: f32[4,128], index: 6, kind: output, shape index: {}]  }
   0x1   :  { %v41_v0 = vld [vmem:[%s318_s4 + $0x78] sm:$0xff]  ;;  %v40_v1 = vld [vmem:[%s318_s4 + $0x70] sm:$0xff]  ;;  %v39_v2 = vld [vmem:[%s318_s4 + $0x68] sm:$0xff] }
   0x2   :  { %43 = vmatpush.msra.mxu0 %v41_v0  ;;  %94 = vmatpush.msra.mxu2 %v41_v0  ;;  %v38_v3 = vld [vmem:[%s318_s4 + $0x60] sm:$0xff] }
   0x4   :  { %44 = vmatpush.msra.mxu0 %v40_v1  ;;  %95 = vmatpush.msra.mxu2 %v40_v1 }
   0x6   :  { %45 = vmatpush.msra.mxu0 %v39_v2  ;;  %96 = vmatpush.msra.mxu2 %v39_v2 }
   0x7   :  { %11 = vsyncpa [#allocation3], 0  ;;  %v37_v4 = vld [vmem:[%s318_s4 + $0x58] sm:$0xff]  ;;  %v36_v5 = vld [vmem:[%s318_s4 + $0x50] sm:$0xff]  ;;  %vm68_vm0 = vcmask 1043456   ;;  %vm64_vm1 = vcmask 31744  }
   0x8   :  { %46 = vmatpush.msra.mxu0 %v38_v3  ;;  %97 = vmatpush.msra.mxu2 %v38_v3  ;;  %v35_v6 = vld [vmem:[%s318_s4 + $0x48] sm:$0xff]  ;;  %v34_v7 = vld [vmem:[%s318_s4 + $0x40] sm:$0xff]  ;;  %v33_v8 = vld [vmem:[%s318_s4 + $0x38] sm:$0xff]  ;;  %s212_s12 = smov [#allocation2]   ;;  %s168_s16 = sshll.u32 %s320_s6, 4  ;;  %s169_s16 = int_to_ptr.hbm [resolvable:$true] %s168_s16 }
   0x9   :  { %v32_v9 = vld [vmem:[%s318_s4 + $0x30] sm:$0xff]  ;;  %v31_v10 = vld [vmem:[%s318_s4 + $0x28] sm:$0xff]  ;;  %v30_v11 = vld [vmem:[%s318_s4 + $0x20] sm:$0xff]  ;;  %s166_s13 = sshll.u32 %s212_s12, 4  ;;  %s167_s13 = int_to_ptr.vmem [resolvable:$true] %s166_s13 }
   0xa   :  { %47 = vmatpush.msra.mxu0 %v37_v4  ;;  %98 = vmatpush.msra.mxu2 %v37_v4  ;;  %v29_v12 = vld [vmem:[%s318_s4 + $0x18] sm:$0xff]  ;;  %v28_v13 = vld [vmem:[%s318_s4 + $0x10] sm:$0xff]  ;;  %v27_v14 = vld [vmem:[%s318_s4 + $0x8] sm:$0xff] }
   0xb   :  { %v26_v15 = vld [vmem:[%s318_s4] sm:$0xff] }
   0xc   :  { %48 = vmatpush.msra.mxu0 %v36_v5  ;;  %99 = vmatpush.msra.mxu2 %v36_v5  ;;  %v25_v16 = vld [vmem:[%s315_s1] sm:$0xf] }
   0xd   :  { %v42_v17 = vld [vmem:[%s319_s5] sm:$0xf] }
   0xe   :  { %49 = vmatpush.msra.mxu0 %v35_v6  ;;  %100 = vmatpush.msra.mxu2 %v35_v6  ;;  %v182_v33 = vld [vmem:[%s316_s2] ss:$0 sm:$0xff] }
   0xf   :  { %177 = vmatpush.msk.msra.mxu1 %vm68_vm0, %v42_v17  ;;  %179 = vmatpush.msk.msra.mxu3 %vm68_vm0, %v42_v17  ;;  %v24_v36 = vld [vmem:[%s314_s0] sm:$0xf] }
  0x10   :  { %50 = vmatpush.msra.mxu0 %v34_v7  ;;  %101 = vmatpush.msra.mxu2 %v34_v7  ;;  %v183_v38 = vld [vmem:[%s317_s3] ss:$0 sm:$0xff] }
  0x12   :  { %51 = vmatpush.msra.mxu0 %v33_v8  ;;  %102 = vmatpush.msra.mxu2 %v33_v8 }
  0x14   :  { %52 = vmatpush.msra.mxu0 %v32_v9  ;;  %103 = vmatpush.msra.mxu2 %v32_v9 }
  0x16   :  { %53 = vmatpush.msra.mxu0 %v31_v10  ;;  %104 = vmatpush.msra.mxu2 %v31_v10 }
  0x18   :  { %54 = vmatpush.msra.mxu0 %v30_v11  ;;  %105 = vmatpush.msra.mxu2 %v30_v11 }
  0x1a   :  { %55 = vmatpush.msra.mxu0 %v29_v12  ;;  %106 = vmatpush.msra.mxu2 %v29_v12 }
  0x1c   :  { %56 = vmatpush.msra.mxu0 %v28_v13  ;;  %107 = vmatpush.msra.mxu2 %v28_v13 }
  0x1e   :  { %57 = vmatpush.msra.mxu0 %v27_v14  ;;  %108 = vmatpush.msra.mxu2 %v27_v14 }
  0x20   :  { %58 = vmatpush.msra.mxu0 %v26_v15  ;;  %109 = vmatpush.msra.mxu2 %v26_v15 }
  0x21   :  { %59 = vmatmul.f32.vlgmr.msra.gmra.mxu0 %v25_v16 }
  0x9e   :  { %v60_v18 = vpop.f32.mrf.mxu0 }
  0x9f   :  { %v63_v19 = vmul.f32 0.03125, %v60_v18 }
  0xa1   :  { %178 = vmatmul.msk.f32.vlgmr.msra.gmra.mxu1 %vm64_vm1, %v63_v19 }
 0x11e   :  { %v89_v20 = vpop.f32.mrf.mxu1 }
 0x11f   :  { %v92_v21 = vsub.f32 %v25_v16, %v89_v20 }
 0x121   :  { %v93_v22 = vmul.f32 %v92_v21, %v92_v21 }
 0x123   :  { %110 = vmatmul.f32.vlgmr.msra.gmra.mxu2 %v93_v22 }
 0x1a6   :  { %v111_v23 = vpop.f32.mrf.mxu2 }
 0x1a7   :  { %v114_v24 = vmul.f32 0.03125, %v111_v23 }
 0x1a9   :  { %180 = vmatmul.msk.f32.vlgmr.msra.gmra.mxu3 %vm64_vm1, %v114_v24 }
 0x22c   :  { %v135_v25 = vpop.f32.mrf.mxu3 }
 0x22d   :  { %v136_v26 = vadd.f32 1e-05, %v135_v25 }
 0x22f   :  { %184 = vrsqrt.f32 %v136_v26  ;;  %vm144_vm3 = vweird.f32 %v136_v26 }
 0x235   :  { %v185_v27 = vpop.eup %184 }
 0x236   :  { %v139_v28 = vmul.f32 %v185_v27, %v136_v26  ;;  %vm145_vm2 = vweird.f32 %v185_v27 }
 0x237   :  { %vm146_vm4 = vmor %vm144_vm3, %vm145_vm2 }
 0x238   :  { %v140_v29 = vmul.f32 %v185_v27, %v139_v28 }
 0x23a   :  { %v141_v30 = vmul.f32 0.5, %v140_v29 }
 0x23c   :  { %v142_v31 = vsub.f32 1.5, %v141_v30 }
 0x23e   :  { %v143_v32 = vmul.f32 %v185_v27, %v142_v31 }
 0x240   :  { %v147_v34 = vsel %vm146_vm4, %v185_v27, %v143_v32 }
 0x241   :  { %v148_v35 = vmul.f32 %v147_v34, %v92_v21 }
 0x243   :  { %v153_v37 = vmul.f32 %v182_v33, %v148_v35 }
 0x245   :  { %v154_v39 = vadd.f32 %v153_v37, %v24_v36 }
 0x247   :  { %v159_v40 = vadd.f32 %v183_v38, %v154_v39 }
 0x249   :  { %160 = vst [vmem:[#allocation2] sm:$0xf] %v159_v40 }
 0x24a   :  { %171 = dma.vmem_to_hbm [thread:$0]  %s167_s13, 64, %s169_s16, [#allocation3]  }
 0x24b   :  { %210 = dma.done.wait [#allocation3], 64  }
 0x24c   :  { %211 = vsyncadd [#allocation3], 4294967232 }
 0x24d   :  { %176 = vsyncpa [#allocation3], 1 }

</bundles_post_ra>
